<compile_context>
chip_gen: v6e
topology: v6e:2x2x1
jax: 0.10.0
libtpu: 0.0.40
codegen_flags: <defaults>
</compile_context>

<pallas_src>
import jax
import jax.numpy as jnp
from jax import lax
from jax.experimental import pallas as pl
from jax.experimental.pallas import tpu as pltpu


# ----------------------------------------------------------------------------
# Kernel bodies
# ----------------------------------------------------------------------------
def _grad_rows(g, above, below, row_first, row_last, col_first, col_last):
    """Gradients for one gray tile g:(TH,W); above/below:(1,W) clamped rows."""
    TH, W = g.shape
    # Horizontal replicate-padded central difference along W (lane axis).
    if W > 1:
        x_plus = jnp.where(col_last, g, pltpu.roll(g, shift=W - 1, axis=1))
        x_minus = jnp.where(col_first, g, pltpu.roll(g, shift=1, axis=1))
        gx = x_plus - x_minus
    else:
        gx = jnp.zeros_like(g)
    # Vertical: neighbours inside the tile via roll; rows just outside the
    # tile come from the (replicate-clamped) halo rows.
    if TH > 1:
        y_minus = jnp.where(row_first, above, pltpu.roll(g, shift=1, axis=0))
        y_plus = jnp.where(row_last, below, pltpu.roll(g, shift=TH - 1, axis=0))
    else:
        y_minus = jnp.broadcast_to(above, g.shape)
        y_plus = jnp.broadcast_to(below, g.shape)
    gy = y_plus - y_minus
    # Magnitude: sqrt(s) = s * rsqrt(s); rsqrt runs on the (idle) EUP slot.
    s = gx * gx + gy * gy + 1e-6
    gmag = s * lax.rsqrt(s)
    return gx, gy, gmag


def _gradient_kernel_whole(x_ref, o_ref):
    """Whole-image tiles (num_h == 1). x:(TB,C,H,W) -> o:(TB,3,H,W)."""
    TB, C, TH, W = x_ref.shape
    col = lax.broadcasted_iota(jnp.int32, (TH, W), 1)
    row = lax.broadcasted_iota(jnp.int32, (TH, W), 0)
    col_first, col_last = col == 0, col == W - 1
    row_first, row_last = row == 0, row == TH - 1

    def process(b):
        xb = x_ref[b].astype(jnp.float32)                       # (C, TH, W)
        g = jnp.mean(xb, axis=0) if C > 1 else xb[0]             # (TH, W)
        gx, gy, gm = _grad_rows(g, g[0:1, :], g[TH - 1:TH, :],
                                row_first, row_last, col_first, col_last)
        o_ref[b] = jnp.stack([gx, gy, gm], axis=0).astype(o_ref.dtype)

    if TB == 1:
        process(0)
    else:
        def body(b, carry):
            process(b)
            return carry
        lax.fori_loop(0, TB, body, 0)


def _gradient_kernel_tiled(x_ref, above_ref, below_ref, o_ref):
    """H-tiled path (TB == 1).  above/below are the clamped halo rows."""
    _, C, TH, W = x_ref.shape
    col = lax.broadcasted_iota(jnp.int32, (TH, W), 1)
    row = lax.broadcasted_iota(jnp.int32, (TH, W), 0)
    col_first, col_last = col == 0, col == W - 1
    row_first, row_last = row == 0, row == TH - 1

    xb = x_ref[0].astype(jnp.float32)                            # (C, TH, W)
    ab = above_ref[0].astype(jnp.float32)                        # (C, 1, W)
    bb = below_ref[0].astype(jnp.float32)                        # (C, 1, W)
    if C > 1:
        g = jnp.mean(xb, axis=0)
        above = jnp.mean(ab, axis=0)
        below = jnp.mean(bb, axis=0)
    else:
        g, above, below = xb[0], ab[0], bb[0]

    gx, gy, gm = _grad_rows(g, above, below,
                            row_first, row_last, col_first, col_last)
    o_ref[0] = jnp.stack([gx, gy, gm], axis=0).astype(o_ref.dtype)


# ----------------------------------------------------------------------------
# Tiling / wrapper
# ----------------------------------------------------------------------------
def _vmem_capacity():
    try:
        cap = getattr(pltpu.get_tpu_info(), "vmem_capacity_bytes", None)
        if cap:
            return int(cap)
    except Exception:
        pass
    return 64 << 20  # conservative (v7x-sized) default


def _choose_tiles(N, C, H, W, itemsize, vmem_cap):
    """Pick (batch tile TB, H tile TH)."""
    sub = max(8, 32 // max(1, itemsize))      # native sublane tile for dtype
    row_bytes = (C + 3) * W * itemsize        # in + out bytes per image row
    per_image = row_bytes * H
    # Per-step in+out byte budget: generation-aware (~10.5 MiB on 128 MiB
    # VMEM parts, ~5.3 MiB on v7x's 64 MiB).  Leaves room for the x2 of
    # double-buffering plus in-kernel f32 temporaries.
    budget = max(2 << 20, vmem_cap // 12)

    # Small images: batch-block several per grid step (amortize ~0.35 us/step).
    TB = 1
    for d in range(min(N, 64), 0, -1):
        if N % d == 0 and d * per_image <= budget:
            TB = d
            break

    # Large images: H-tile so one step's in+out block fits the budget.
    # Prefer TH a multiple of the dtype's sublane tile; fall back to any
    # divisor of H so the block is guaranteed to fit.
    TH = H
    if per_image > budget:
        best_any, best_sub = 1, 0
        for d in range(1, H + 1):
            if H % d == 0 and d * row_bytes <= budget:
                best_any = d
                if d % sub == 0:
                    best_sub = d
        TH = best_sub if best_sub else best_any

    # Guarantee >= 2 grid steps when possible so both of v7x's TensorCores
    # get work (both grid axes are "parallel").
    if (N // TB) * (H // TH) < 2:
        if N >= 2:
            for d in range(TB // 2, 0, -1):
                if N % d == 0:
                    TB = d
                    break
        else:
            half = (TH // 2) - ((TH // 2) % sub)
            for d in range(half, 0, -sub):
                if H % d == 0:
                    TH = d
                    break
    return TB, TH


def gradient_extractor(x):
    """x: (N, C, H, W) -> (N, 3, H, W) = [grad_x, grad_y, grad_mag], same dtype."""
    N, C, H, W = x.shape
    out_dtype = x.dtype
    itemsize = jnp.dtype(x.dtype).itemsize
    vmem_cap = _vmem_capacity()
    TB, TH = _choose_tiles(N, C, H, W, itemsize, vmem_cap)
    num_h = H // TH

    # VMEM limit derived from the chosen tile: double-buffered in/halo/out
    # blocks + per-image f32 temporaries + headroom, clamped to 90% physical.
    in_block = TB * C * TH * W * itemsize
    out_block = TB * 3 * TH * W * itemsize
    halo_block = (2 * TB * C * 8 * W * itemsize) if num_h > 1 else 0  # sublane-padded
    temps = (C + 16) * TH * W * 4
    vmem_limit = int(min(max(2 * (in_block + out_block + halo_block) + temps + (4 << 20),
                             32 << 20),
                         vmem_cap * 9 // 10))

    cost = pl.CostEstimate(
        flops=int(N * H * W * (C + 12)),
        transcendentals=int(N * H * W),
        bytes_accessed=int((N * C * H * W + N * C * num_h * 2 * W) * itemsize
                           + N * 3 * H * W * itemsize),
    )

    if num_h == 1:
        kernel = _gradient_kernel_whole
        grid = (N // TB,)
        in_specs = [pl.BlockSpec((TB, C, H, W), lambda n: (n, 0, 0, 0))]
        out_specs = pl.BlockSpec((TB, 3, H, W), lambda n: (n, 0, 0, 0))
        dims = ("parallel",)
        args = (x,)
    else:
        # TB == 1 on this path.  Halo rows are fetched via clamped single-row
        # BlockSpecs (block size 1 along H => block index IS the element row).
        kernel = _gradient_kernel_tiled
        grid = (N, num_h)
        in_specs = [
            pl.BlockSpec((1, C, TH, W), lambda n, h: (n, 0, h, 0)),
            pl.BlockSpec((1, C, 1, W),
                         lambda n, h: (n, 0, jnp.maximum(h * TH - 1, 0), 0)),
            pl.BlockSpec((1, C, 1, W),
                         lambda n, h: (n, 0, jnp.minimum((h + 1) * TH, H - 1), 0)),
        ]
        out_specs = pl.BlockSpec((1, 3, TH, W), lambda n, h: (n, 0, h, 0))
        dims = ("parallel", "parallel")
        args = (x, x, x)

    return pl.pallas_call(
        kernel,
        out_shape=jax.ShapeDtypeStruct((N, 3, H, W), out_dtype),
        grid=grid,
        in_specs=in_specs,
        out_specs=out_specs,
        compiler_params=pltpu.CompilerParams(
            dimension_semantics=dims,
            vmem_limit_bytes=vmem_limit,
        ),
        cost_estimate=cost,
    )(*args)


# ----------------------------------------------------------------------------
# Pure-JAX reference (mirrors the PyTorch fallback path)
# ----------------------------------------------------------------------------
def _reference(x):
    gray = jnp.mean(x, axis=1, keepdims=True) if x.shape[1] > 1 else x
    padded = jnp.pad(gray, ((0, 0), (0, 0), (1, 1), (1, 1)), mode="edge")
    grad_x = padded[:, :, 1:-1, 2:] - padded[:, :, 1:-1, :-2]
    grad_y = padded[:, :, 2:, 1:-1] - padded[:, :, :-2, 1:-1]
    grad_mag = jnp.sqrt(grad_x ** 2 + grad_y ** 2 + 1e-6)
    return jnp.concatenate([grad_x, grad_y, grad_mag], axis=1)


if __name__ == "__main__":
    key = jax.random.PRNGKey(0)
    k1, k2, k3 = jax.random.split(key, 3)

    # 1) Small multi-channel smoke test (whole-image path, TB == 1).
    x1 = jax.random.normal(k1, (2, 4, 16, 16), dtype=jnp.float32)
    o1 = jax.block_until_ready(gradient_extractor(x1))
    r1 = _reference(x1)
    assert o1.shape == (2, 3, 16, 16), o1.shape
    assert jnp.allclose(o1, r1, atol=1e-5, rtol=1e-5), "mismatch (2,4,16,16)"

    # 2) Batched small single-channel images (TB > 1 fori_loop path).
    x2 = jax.random.normal(k2, (8, 1, 32, 32), dtype=jnp.float32)
    o2 = jax.block_until_ready(gradient_extractor(x2))
    r2 = _reference(x2)
    assert o2.shape == (8, 3, 32, 32), o2.shape
    assert jnp.allclose(o2, r2, atol=1e-5, rtol=1e-5), "mismatch (8,1,32,32)"

    # 3) Large image (H-tiled path with clamped single-row halo BlockSpecs).
    x3 = jax.random.normal(k3, (1, 3, 512, 512), dtype=jnp.float32)
    o3 = jax.block_until_ready(gradient_extractor(x3))
    r3 = _reference(x3)
    assert o3.shape == (1, 3, 512, 512), o3.shape
    assert jnp.allclose(o3, r3, atol=1e-5, rtol=1e-5), "mismatch (1,3,512,512)"

    print("KERNEL_OK")
</pallas_src>

<mosaic_0001>
module attributes {stable_mosaic.version = 11 : i64} {
  func.func @_gradient_kernel_whole(%arg0: i32, %arg1: memref<1x4x16x16xf32, #tpu.memory_space<vmem>>, %arg2: memref<1x3x16x16xf32, #tpu.memory_space<vmem>>) attributes {dimension_semantics = [#tpu.dimension_semantics<parallel>], iteration_bounds = array<i64: 2>, scalar_prefetch = 0 : i64, scratch_operands = 0 : i64, tpu.core_type = #tpu.core_type<tc>, window_params = [{transform_indices = @transform_0, window_bounds = array<i64: 1, 4, 16, 16>}, {transform_indices = @transform_1, window_bounds = array<i64: 1, 3, 16, 16>}]} {
    %0 = tpu.iota {dimensions = array<i32: 1>} : vector<16x16xi32>
    %1 = tpu.iota {dimensions = array<i32: 0>} : vector<16x16xi32>
    %c0_i32 = arith.constant 0 : i32
    %2 = vector.broadcast %c0_i32 : i32 to vector<16x16xi32>
    %3 = arith.cmpi eq, %0, %2 : vector<16x16xi32>
    %c15_i32 = arith.constant 15 : i32
    %4 = vector.broadcast %c15_i32 : i32 to vector<16x16xi32>
    %5 = arith.cmpi eq, %0, %4 : vector<16x16xi32>
    %c0_i32_0 = arith.constant 0 : i32
    %6 = vector.broadcast %c0_i32_0 : i32 to vector<16x16xi32>
    %7 = arith.cmpi eq, %1, %6 : vector<16x16xi32>
    %c15_i32_1 = arith.constant 15 : i32
    %8 = vector.broadcast %c15_i32_1 : i32 to vector<16x16xi32>
    %9 = arith.cmpi eq, %1, %8 : vector<16x16xi32>
    %c0 = arith.constant 0 : index
    %c0_2 = arith.constant 0 : index
    %c0_3 = arith.constant 0 : index
    %c0_4 = arith.constant 0 : index
    %10 = vector.load %arg1[%c0, %c0_2, %c0_3, %c0_4] : memref<1x4x16x16xf32, #tpu.memory_space<vmem>>, vector<1x4x16x16xf32>
    %11 = vector.shape_cast %10 : vector<1x4x16x16xf32> to vector<4x16x16xf32>
    %cst = arith.constant dense<0.000000e+00> : vector<16x16xf32>
    %12 = vector.multi_reduction <add>, %11, %cst [0] : vector<4x16x16xf32> to vector<16x16xf32>
    %cst_5 = arith.constant 4.000000e+00 : f32
    %13 = vector.broadcast %cst_5 : f32 to vector<16x16xf32>
    %14 = arith.divf %12, %13 : vector<16x16xf32>
    %15 = vector.extract_strided_slice %14 {offsets = [0, 0], sizes = [1, 16], strides = [1, 1]} : vector<16x16xf32> to vector<1x16xf32>
    %16 = vector.extract_strided_slice %14 {offsets = [15, 0], sizes = [1, 16], strides = [1, 1]} : vector<16x16xf32> to vector<1x16xf32>
    %c15_i32_6 = arith.constant 15 : i32
    %17 = tpu.dynamic_rotate %14 by %c15_i32_6 dim 1 : vector<16x16xf32>, i32 -> vector<16x16xf32>
    %18 = arith.select %5, %14, %17 : vector<16x16xi1>, vector<16x16xf32>
    %c1_i32 = arith.constant 1 : i32
    %19 = tpu.dynamic_rotate %14 by %c1_i32 dim 1 : vector<16x16xf32>, i32 -> vector<16x16xf32>
    %20 = arith.select %3, %14, %19 : vector<16x16xi1>, vector<16x16xf32>
    %21 = arith.subf %18, %20 : vector<16x16xf32>
    %c1_i32_7 = arith.constant 1 : i32
    %22 = tpu.dynamic_rotate %14 by %c1_i32_7 dim 0 : vector<16x16xf32>, i32 -> vector<16x16xf32>
    %23 = vector.shape_cast %15 : vector<1x16xf32> to vector<1x16xf32>
    %24 = vector.broadcast %23 : vector<1x16xf32> to vector<16x16xf32>
    %25 = arith.select %7, %24, %22 : vector<16x16xi1>, vector<16x16xf32>
    %c15_i32_8 = arith.constant 15 : i32
    %26 = tpu.dynamic_rotate %14 by %c15_i32_8 dim 0 : vector<16x16xf32>, i32 -> vector<16x16xf32>
    %27 = vector.shape_cast %16 : vector<1x16xf32> to vector<1x16xf32>
    %28 = vector.broadcast %27 : vector<1x16xf32> to vector<16x16xf32>
    %29 = arith.select %9, %28, %26 : vector<16x16xi1>, vector<16x16xf32>
    %30 = arith.subf %29, %25 : vector<16x16xf32>
    %31 = arith.mulf %21, %21 : vector<16x16xf32>
    %32 = arith.mulf %30, %30 : vector<16x16xf32>
    %33 = arith.addf %31, %32 : vector<16x16xf32>
    %cst_9 = arith.constant 9.99999997E-7 : f32
    %34 = vector.broadcast %cst_9 : f32 to vector<16x16xf32>
    %35 = arith.addf %33, %34 : vector<16x16xf32>
    %36 = math.rsqrt %35 : vector<16x16xf32>
    %37 = arith.mulf %35, %36 : vector<16x16xf32>
    %38 = vector.shape_cast %21 : vector<16x16xf32> to vector<1x16x16xf32>
    %39 = vector.shape_cast %30 : vector<16x16xf32> to vector<1x16x16xf32>
    %40 = vector.shape_cast %37 : vector<16x16xf32> to vector<1x16x16xf32>
    %41 = tpu.concatenate %38, %39, %40 in 0 : vector<1x16x16xf32>, vector<1x16x16xf32>, vector<1x16x16xf32> -> vector<3x16x16xf32>
    %c0_10 = arith.constant 0 : index
    %c0_11 = arith.constant 0 : index
    %c0_12 = arith.constant 0 : index
    %c0_13 = arith.constant 0 : index
    %42 = vector.load %arg2[%c0_10, %c0_11, %c0_12, %c0_13] : memref<1x3x16x16xf32, #tpu.memory_space<vmem>>, vector<1x3x16x16xf32>
    %43 = vector.shape_cast %42 : vector<1x3x16x16xf32> to vector<3x16x16xf32>
    %44 = vector.shape_cast %41 : vector<3x16x16xf32> to vector<1x3x16x16xf32>
    tpu.vector_store %arg2[%c0_10, %c0_11, %c0_12, %c0_13], %44 {strides = array<i32>} : memref<1x3x16x16xf32, #tpu.memory_space<vmem>>, vector<1x3x16x16xf32>,
    return
  }
  func.func @transform_0(%arg0: i32) -> (i32, i32, i32, i32) {
    %c0_i32 = arith.constant 0 : i32
    %c0_i32_0 = arith.constant 0 : i32
    %c0_i32_1 = arith.constant 0 : i32
    %c0_i32_2 = arith.constant 0 : i32
    return %arg0, %c0_i32, %c0_i32_0, %c0_i32_1 : i32, i32, i32, i32
  }
  func.func @transform_1(%arg0: i32) -> (i32, i32, i32, i32) {
    %c0_i32 = arith.constant 0 : i32
    %c0_i32_0 = arith.constant 0 : i32
    %c0_i32_1 = arith.constant 0 : i32
    %c0_i32_2 = arith.constant 0 : i32
    return %arg0, %c0_i32, %c0_i32_0, %c0_i32_1 : i32, i32, i32, i32
  }
}

</mosaic_0001>

<bundles_post_ra>
// kernel: tpu_custom_call.1
= control target key start
LH: loop header
LB: loop body
LE: loop exit
PB: predicated region body
PF: predicated region fallthrough
CT: control target
= control target key end

     0   :  { %6 = vsyncpa [#allocation3], 0  ;;  %s702_s0 = inlined_call_operand.hbm [shape: f32[2,4,16,16], index: 0, kind: input, shape index: {}]   ;;  %s703_s1 = inlined_call_operand.hbm [shape: f32[2,3,16,16], index: 1, kind: output, shape index: {}]  }
   0x1   :  { %8 = vsyncpa [#allocation3 + $0x1], 0 }
   0x2   :  { %9 = vsyncpa [#allocation4], 0 }
   0x3   :  { %11 = vsyncpa [#allocation4 + $0x1], 0  ;;  %s518_s6 = smov 0   ;;  %s520_s7 = smov 0  }
   0x4   :  { %s522_s8 = smov 0   ;;  %s524_s9 = smov 0  }
   0x5 LB: > { %s539_s10 = sadd.s32 4294967295, %s497_s9   ;;  %s334_s11 = sadd.s32 4294967294, %s497_s9   ;;  %s497_s9 = sphi %s524_s9, %s718_s9   ;;  %s493_s8 = sphi %s522_s8, %s717_s8   ;;  %s489_s7 = sphi %s520_s7, %s716_s7   ;;  %s485_s6 = sphi %s518_s6, %s715_s6  }
   0x6   : > { %s543_s12 = sadd.s32 1, %s497_s9   ;;  %s24_s13 = sadd.s32 1, %s493_s8 }
   0x7   : > { %s21_s14 = ssub.s32 %s497_s9, %s543_s12  ;;  %p31_p0 = scmp.ne.s32.totalorder %s493_s8, %s489_s7 }
   0x8   : > { %p22_p1 = scmp.eq.s32.totalorder %s21_s14, 0  ;;  %p32_p2 = scmp.eq.s32.totalorder %s497_s9, 0 }
   0x9   : > { %p37_p3 = scmp.ne.s32.totalorder %s489_s7, %s485_s6  ;;  %p38_p4 = scmp.eq.s32.totalorder %s539_s10, 0 }
   0xa   : > { %s555_s15 = scalar_select %p22_p1, %s493_s8, %s24_s13  }
   0xb   : > { %p557_p5 = por %p32_p2, %p31_p0  ;;  %p561_p6 = por %p38_p4, %p37_p3 }
   0xc   : > { %p61_p7 = scmp.eq.s32.totalorder %s539_s10, 1  ;;  %p67_p8 = scmp.eq.s32.totalorder %s334_s11, 1 }
   0xd   : > { %s707_s17 = scalar_select %p561_p6, 1, 0 }
   0xe   : > { %p360_p10 = scmp.lt.s32.totalorder %s497_s9, 2  ;;  %p568_p11 = por %p61_p7, %p31_p0 }
   0xf   : > { %p572_p12 = por %p67_p8, %p37_p3  ;;  %s87_s20 = sand.u32 1, %s493_s8  }
  0x10   : > { %s708_s18 = scalar_select %p568_p11, 1, 0 }
  0x11   : > { %s709_s19 = scalar_select %p572_p12, 1, 0 }
  0x12   : > { %s345_s21 = sshll.u32 %s497_s9, 10  ;;  %s337_s22 = sshll.u32 %s87_s20, 6 }
  0x13   : > { %s581_s25 = scalar_lea.hbm %s702_s0, %s345_s21  ;;  %s91_s26 = scalar_lea.vmem [#allocation2], %s337_s22 }
  0x14   : > { %s98_s27 = sshll.u32 %s91_s26, 4  ;;  %p585_p13 = pnand %p360_p10, %p557_p5  ;;  %s589_s27 = int_to_ptr.vmem [resolvable:$true] %s98_s27 }
  0x15   : > { %s591_s29 = scalar_lea.sflag [#allocation3], %s87_s20  ;;  %s405_s30 = scalar_lea.hbm %s581_s25, 1024 }
  0x16   : > { %p406_p0 = scmp.ne.s32.totalorder %s581_s25, %s405_s30  ;;  %p407_p1 = pneg %p585_p13 }
  0x17   : > { %s410_s4 = scalar_lea.hbm %s702_s0, 2048  ;;  %p411_p4 = scmp.lt.s32.totalorder %s581_s25, %s702_s0 }
  0x18   : > { %p408_p2 = pnand %p407_p1, %p406_p0  ;;  %p412_p5 = scmp.lt.s32.totalorder %s410_s4, %s405_s30 }
  0x1a   : > { %p409_p3 = pneg %p408_p2  ;;  %p413_p7 = por %p412_p5, %p411_p4 }
  0x1c   : > { %p414_p8 = pnand %p413_p7, %p409_p3 }
  0x1e   : > { %417 = shalt.err (!%p414_p8)
}
  0x1f   : > { %s418_s13 = scalar_lea.vmem %s589_s27, 1024  ;;  %s499_s14 = smov [#allocation2]  }
  0x20   : > { %p419_p10 = scmp.ne.s32.totalorder %s589_s27, %s418_s13  ;;  %s423_s16 = sshll.u32 %s499_s14, 4  ;;  %s424_s16 = int_to_ptr.vmem [resolvable:$false] %s423_s16 }
  0x21   : > { %s425_s20 = scalar_lea.vmem %s424_s16, 2048  ;;  %p426_p2 = scmp.lt.s32.totalorder %s589_s27, %s424_s16 }
  0x22   : > { %p421_p9 = pnand %p419_p10, %p407_p1  ;;  %p427_p12 = scmp.lt.s32.totalorder %s425_s20, %s418_s13 }
  0x24   : > { %p422_p0 = pneg %p421_p9  ;;  %p428_p11 = por %p427_p12, %p426_p2 }
  0x26   : > { %p429_p6 = pnand %p428_p11, %p422_p0 }
  0x28   : > { %432 = shalt.err (!%p429_p6)
}
  0x29   : > { %s500_s21 = smov 128   ;;  %s501_s22 = smov 8  }
  0x2a   : > { %355 = dma.hbm_to_vmem [thread:$0]  (!%p585_p13), %s581_s25, 1024, %s589_s27, %s591_s29, %s500_s21, %s500_s21, %s501_s22  }
  0x2b   : > { %p340_p9 = scmp.ge.s32.totalorder %s497_s9, 1  ;;  %p106_p1 = scmp.lt.s32.totalorder %s497_s9, 3 }
  0x2d   : > { %p107_p3 = pnand %p340_p9, %p106_p1 }
  0x2e   : > { %s615_s23 = sand.u32 (!%p107_p3), 1, %s489_s7   ;;  %p711_p6 = scmp.ne.s32.totalorder (!%p107_p3), %s707_s17, 0 }
  0x2f   : > { %110 = sbr.rel (%p107_p3) target bundleno = 457 (0x1c9), region = 24  ;;  %s341_s24 = sshll.u32 (!%p107_p3), %s615_s23, 6 }
  0x30   : > { %s113_s26 = scalar_lea.sflag (!%p107_p3), [#allocation3], %s615_s23  ;;  %s116_s30 = scalar_lea.vmem (!%p107_p3), [#allocation2], %s341_s24 }
  0x34   : > { %476 = dma.done.wait (%p711_p6), %s113_s26, 1024  }
  0x35   : > { %478 = vsyncadd (%p711_p6), %s113_s26, 4294966272  ;;  %vm154_vm0 = vcmask 130048   ;;  %v146_v0 = vld [vmem:[%s116_s30] sm:$0xff]  ;;  %v148_v1 = vld [vmem:[%s116_s30 + $0x10] sm:$0xff]  ;;  %s502_s17 = smov 16   ;;  %vm172_vm1 = vcmask 1047680   ;;  %v135_v28 = vlaneseq }
  0x36   : > { %v150_v2 = vld [vmem:[%s116_s30 + $0x20] sm:$0xff]  ;;  %v152_v3 = vld [vmem:[%s116_s30 + $0x30] sm:$0xff]  ;;  %v155_v4 = vsel %vm154_vm0, %v146_v0, 0.0  ;;  %v156_v5 = vsel %vm154_vm0, %v148_v1, 0.0  ;;  %v147_v7 = vld [vmem:[%s116_s30 + $0x8] sm:$0xff]  ;;  %s346_s25 = smul.u32 48, %s615_s23 }
  0x37   : > { %v158_v6 = vsel %vm154_vm0, %v150_v2, 0.0  ;;  %v149_v8 = vld [vmem:[%s116_s30 + $0x18] sm:$0xff]  ;;  %v157_v9 = vadd.f32 %v156_v5, %v155_v4  ;;  %v151_v10 = vld [vmem:[%s116_s30 + $0x28] sm:$0xff]  ;;  %v162_v12 = vsel %vm154_vm0, %v147_v7, 0.0  ;;  %v160_v14 = vsel %vm154_vm0, %v152_v3, 0.0  ;;  %s503_s28 = smov 127  }
  0x38   : > { %v153_v11 = vld [vmem:[%s116_s30 + $0x38] sm:$0xff]  ;;  %v163_v13 = vsel %vm154_vm0, %v149_v8, 0.0  ;;  %v165_v16 = vsel %vm154_vm0, %v151_v10, 0.0  ;;  %v138_v29 = vshrl.u32 %v135_v28, 7  ;;  %s635_s27 = scalar_lea.vmem [#allocation5], %s346_s25  ;;  %s504_s29 = smov 113  }
  0x39   : > { %v164_v15 = vadd.f32 %v163_v13, %v162_v12  ;;  %v159_v17 = vadd.f32 %v158_v6, %v157_v9  ;;  %v167_v18 = vsel %vm154_vm0, %v153_v11, 0.0  ;;  %v136_v51 = vand.u32 127, %v135_v28  ;;  %s347_s2 = smul.u32 768, %s539_s10  ;;  %s261_s3 = sshll.u32 %s635_s27, 4  ;;  %s657_s3 = int_to_ptr.vmem [resolvable:$true] %s261_s3 }
  0x3a   : > { %v212_v30 = vsub.s32 0, %v138_v29  ;;  %vm207_vm2 = vcmp.lt.s32.totalorder %v138_v29, 1  ;;  %vm142_vm3 = vcmp.eq.s32.totalorder %v138_v29, 0  ;;  %vm218_vm4 = vcmp.lt.s32.totalorder %v138_v29, 7  ;;  %s248_s13 = scalar_lea.sflag [#allocation4], %s615_s23  ;;  %s433_s10 = scalar_lea.vmem %s657_s3, 768 }
  0x3b   : > { %v166_v19 = vadd.f32 %v165_v16, %v164_v15  ;;  %v161_v20 = vadd.f32 %v160_v14, %v159_v17  ;;  %v223_v39 = vsub.s32 7, %v138_v29  ;;  %v139_v41 = vadd.s32 8, %v138_v29  ;;  %s655_s11 = scalar_lea.hbm %s703_s1, %s347_s2  ;;  %p434_p11 = scmp.ne.s32.totalorder %s657_s3, %s433_s10 }
  0x3c   : > { %vm141_vm6 = vcmp.eq.s32.totalorder %v136_v51, 15  ;;  %vm140_vm7 = vcmp.eq.s32.totalorder %v136_v51, 0  ;;  %p712_p12 = scmp.ne.s32.totalorder %s708_s18, 0  ;;  %s505_s14 = smov [#allocation5]  }
  0x3d   : > { %v168_v21 = vadd.f32 %v167_v18, %v166_v19  ;;  %v170_v22 = vmul.f32 0.25, %v161_v20  ;;  %vm145_vm5 = vcmp.eq.s32.totalorder %v139_v41, 15  ;;  %s437_s16 = sshll.u32 %s505_s14, 4  ;;  %s438_s16 = int_to_ptr.vmem [resolvable:$false] %s437_s16 }
  0x3e   : > { %p435_p13 = pnand %p434_p11, %p712_p12  ;;  %s439_s20 = scalar_lea.vmem %s438_s16, 1536 }
  0x3f   : > { %173 = vrot.lane.b32.xlu0 %v170_v22, %s502_s17  ;;  %v171_v23 = vmul.f32 0.25, %v168_v21  ;;  %v205_v32 = vrot.slane %v170_v22, 7  ;;  %v213_v34 = vrot.slane %v170_v22, %v212_v30  ;;  %v216_v35 = vrot.slane %v170_v22, 1  ;;  %p440_p5 = scmp.lt.s32.totalorder %s657_s3, %s438_s16  ;;  %p441_p7 = scmp.lt.s32.totalorder %s439_s20, %s433_s10 }
  0x40   : > { %p436_p4 = pneg %p435_p13 }
  0x41   : > { %v206_v31 = vrot.slane %v171_v23, 7  ;;  %v217_v33 = vrot.slane %v171_v23, 1  ;;  %v224_v42 = vrot.slane %v171_v23, %v223_v39  ;;  %p442_p8 = por %p441_p7, %p440_p5 }
  0x43   : > { %176 = vrot.lane.b32.xlu0 %v171_v23, %s502_s17  ;;  %v209_v36 = vsel %vm207_vm2, %v206_v31, %v205_v32  ;;  %v219_v38 = vsel %vm218_vm4, %v216_v35, %v217_v33  ;;  %v220_v43 = vsel %vm218_vm4, %v217_v33, %v216_v35  ;;  %v208_v44 = vsel %vm207_vm2, %v205_v32, %v206_v31  ;;  %p443_p10 = pnand %p442_p8, %p436_p4 }
  0x44   : > { %v214_v37 = vsel %vm142_vm3, %v213_v34, %v209_v36  ;;  %v226_v45 = vsel %vm145_vm5, %v224_v42, %v220_v43 }
  0x45   : > { %v227_v40 = vsub.f32 %v219_v38, %v214_v37  ;;  %v228_v46 = vsub.f32 %v226_v45, %v208_v44 }
  0x47   : > { %243 = vst.msk [vmem:[%s635_s27 + $0x10] sm:$0xff] %vm154_vm0, %v227_v40  ;;  %244 = vst.msk [vmem:[%s635_s27 + $0x18] sm:$0xff] %vm154_vm0, %v228_v46  ;;  %v231_v58 = vmul.f32 %v227_v40, %v227_v40  ;;  %v232_v1 = vmul.f32 %v228_v46, %v228_v46 }
  0xb1   : > { %v174_v24 = vpop.permute.xlu0 %173 }
  0xb2   : > { %v175_v25 = vsel %vm172_vm1, %v174_v24, %v170_v22 }
  0xb3   : > { %179 = vrot.lane.b32.xlu1 %v175_v25, %s502_s17 }
  0xb5   : > { %v177_v26 = vpop.permute.xlu0 %176 }
  0xb6   : > { %v178_v27 = vsel %vm172_vm1, %v177_v26, %v171_v23 }
  0xb7   : > { %181 = vrot.lane.b32.xlu1 %v178_v27, %s502_s17 }
 0x125   : > { %v180_v47 = vpop.permute.xlu1 %179 }
 0x126   : > { %v183_v48 = vsel %vm172_vm1, %v180_v47, %v170_v22 }
 0x127   : > { %187 = vrot.lane.b32.xlu0 %v183_v48, %s503_s28 }
 0x129   : > { %v182_v49 = vpop.permute.xlu1 %181 }
 0x12a   : > { %v184_v50 = vsel %vm172_vm1, %v182_v49, %v171_v23 }
 0x12b   : > { %195 = vrot.lane.b32.xlu0 %v183_v48, %s504_s29  ;;  %189 = vrot.lane.b32.xlu1 %v184_v50, %s503_s28 }
 0x12f   : > { %197 = vrot.lane.b32.xlu1 %v184_v50, %s504_s29 }
 0x199   : > { %v188_v52 = vpop.permute.xlu0 %187 }
 0x19a   : > { %v193_v55 = vsel %vm141_vm6, %v170_v22, %v188_v52 }
 0x19d   : > { %v190_v53 = vpop.permute.xlu1 %189  ;;  %v196_v54 = vpop.permute.xlu0 %195 }
 0x19e   : > { %v201_v56 = vsel %vm140_vm7, %v170_v22, %v196_v54  ;;  %v194_v61 = vsel %vm141_vm6, %v171_v23, %v190_v53 }
 0x19f   : > { %v203_v57 = vsub.f32 %v193_v55, %v201_v56 }
 0x1a1   : > { %v229_v59 = vmul.f32 %v203_v57, %v203_v57  ;;  %241 = vst.msk [vmem:[%s635_s27] sm:$0xff] %vm154_vm0, %v203_v57  ;;  %v198_v60 = vpop.permute.xlu1 %197 }
 0x1a2   : > { %v202_v62 = vsel %vm140_vm7, %v171_v23, %v198_v60 }
 0x1a3   : > { %v233_v63 = vadd.f32 %v231_v58, %v229_v59  ;;  %v204_v0 = vsub.f32 %v194_v61, %v202_v62 }
 0x1a5   : > { %v235_v2 = vadd.f32 1e-06, %v233_v63  ;;  %v230_v3 = vmul.f32 %v204_v0, %v204_v0  ;;  %242 = vst.msk [vmem:[%s635_s27 + $0x8] sm:$0xff] %vm154_vm0, %v204_v0 }
 0x1a7   : > { %401 = vrsqrt.f32 %v235_v2  ;;  %v234_v4 = vadd.f32 %v232_v1, %v230_v3 }
 0x1a9   : > { %v236_v5 = vadd.f32 1e-06, %v234_v4 }
 0x1ab   : > { %403 = vrsqrt.f32 %v236_v5 }
 0x1b4   : > { %v402_v6 = vpop.eup %401 }
 0x1b5   : > { %v239_v7 = vmul.f32 %v402_v6, %v235_v2 }
 0x1b7   : > { %245 = vst.msk [vmem:[%s635_s27 + $0x20] sm:$0xff] %vm154_vm0, %v239_v7 }
 0x1b8   : > { %v404_v8 = vpop.eup %403 }
 0x1b9   : > { %v240_v9 = vmul.f32 %v404_v8, %v236_v5 }
 0x1bb   : > { %246 = vst.msk [vmem:[%s635_s27 + $0x28] sm:$0xff] %vm154_vm0, %v240_v9 }
 0x1bc   : > { %446 = shalt.err (!%p443_p10)
}
 0x1bd   : > { %s447_s21 = scalar_lea.hbm %s655_s11, 768  ;;  %s451_s26 = scalar_lea.hbm %s703_s1, 1536 }
 0x1be   : > { %p448_p0 = scmp.ne.s32.totalorder %s655_s11, %s447_s21  ;;  %p452_p1 = scmp.lt.s32.totalorder %s655_s11, %s703_s1 }
 0x1bf   : > { %p453_p3 = scmp.lt.s32.totalorder %s451_s26, %s447_s21 }
 0x1c0   : > { %p449_p2 = pnand %p448_p0, %p712_p12 }
 0x1c1   : > { %p454_p6 = por %p453_p3, %p452_p1 }
 0x1c2   : > { %p450_p9 = pneg %p449_p2 }
 0x1c4   : > { %p455_p11 = pnand %p454_p6, %p450_p9 }
 0x1c6   : > { %458 = shalt.err (!%p455_p11)
}
 0x1c7   : > { %s506_s25 = smov 128   ;;  %s507_s27 = smov 8  }
 0x1c8   : > { %350 = dma.vmem_to_hbm [thread:$0]  (%p712_p12), %s657_s3, 768, %s655_s11, %s248_s13, %s506_s25, %s506_s25, %s507_s27  }
 0x1c9 PF: > { %s276_s28 = sand.u32 1, %s485_s6   ;;  %p713_p13 = scmp.ne.s32.totalorder %s709_s19, 0 }
 0x1ca   : > { %p714_p4 = scmp.ge.s32.totalorder %s497_s9, 2  ;;  %s277_s29 = scalar_lea.sflag [#allocation4], %s276_s28 }
 0x1cc   : > { %p357_p5 = pnand %p714_p4, %p713_p13 }
 0x1ce   : > { %p358_p7 = pneg %p357_p5 }
 0x1d0   : > { %480 = dma.done.wait (%p358_p7), %s277_s29, 768  }
 0x1d1   : > { %482 = vsyncadd (%p358_p7), %s277_s29, 4294966528  ;;  %p14_p8 = scmp.ge.s32.totalorder %s543_s12, 4   ;;  %s715_s6 = smov %s489_s7 }
 0x1d2   : > { %s716_s7 = smov %s493_s8  ;;  %s717_s8 = smov %s555_s15 }
 0x1d3   : > { %s718_s9 = smov %s543_s12  ;;  %16 = sbr.rel (!%p14_p8) target bundleno = 5 (0x5), region = 69 }
 0x1d8   :  { %282 = vsyncpa [#allocation3], 1 }
 0x1d9   :  { %284 = vsyncpa [#allocation3 + $0x1], 1 }
 0x1da   :  { %285 = vsyncpa [#allocation4], 1 }
 0x1db   :  { %287 = vsyncpa [#allocation4 + $0x1], 1 }

</bundles_post_ra>
